<compile_context>
chip_gen: v7x
topology: tpu7x:2x2x1
jax: 0.10.0
libtpu: 0.0.40
codegen_flags: <defaults>
</compile_context>

<pallas_src>
import jax
import jax.numpy as jnp
from jax import lax
from jax.experimental import pallas as pl
from jax.experimental.pallas import tpu as pltpu

EPS = 1e-16          # Pool.eps
NEG_SLOPE = 0.01     # F.leaky_relu default negative_slope
DROP_P = 0.5         # F.dropout default p


def _round_up(x, m):
    return (x + m - 1) // m * m


def _vmem_cap_bytes():
    # 3/4 of per-core VMEM (96 MiB on v5e/v6e, 48 MiB on v7x); fall back to
    # 48 MiB when no TPU is attached (interpret mode on CPU).
    try:
        return int(pltpu.get_tpu_info().vmem_capacity_bytes * 3 // 4)
    except Exception:
        return 48 * 2**20


# ---------------------------------------------------------------------------
# Phase A: combined per-column / per-row sums (+ counts via the ones lane).
# ---------------------------------------------------------------------------
def _stats_kernel(col_ids_ref, row_off_ref, vals_ref, sums_ref):
    t = pl.program_id(1)

    @pl.when(t == 0)
    def _init():
        sums_ref[...] = jnp.zeros_like(sums_ref)

    vals = vals_ref[...]                               # (T, d_ext) bf16
    tsz = vals.shape[0]
    p_tot = sums_ref.shape[1]                          # c_pad + r_pad

    # Combined transposed one-hot: each nnz entry contributes a 1 at its
    # column id (col section, rows [0, c_pad)) and a 1 at c_pad + row id
    # (row section).  Padded entries carry out-of-range ids -> all-zero
    # columns -> no contribution to sums or counts.
    iota = lax.broadcasted_iota(jnp.int32, (p_tot, tsz), 0)
    ohT = jnp.logical_or(iota == col_ids_ref[...],
                         iota == row_off_ref[...]).astype(jnp.bfloat16)

    acc = jnp.dot(ohT, vals, preferred_element_type=jnp.float32)   # (P, d_ext)
    sums_ref[...] += acc[None, :, :]


# ---------------------------------------------------------------------------
# Phase B: gather projected means, fused linear, leaky_relu, dropout mask.
# ---------------------------------------------------------------------------
def _make_apply_kernel(with_dropout):
    def kernel(col_ids_ref, row_off_ref, vals_ref, mw_ref, w0_ref, *rest):
        if with_dropout:
            mask_ref, out_ref = rest
        else:
            (out_ref,) = rest

        vals = vals_ref[...]                           # (T, d_ext) bf16
        tsz = vals.shape[0]
        p_tot = mw_ref.shape[0]                        # c_pad + r_pad

        # Combined one-hot (two ones per row): gathers col_mean@w1 + row_mean@w2
        # in a single MXU matmul against the pre-projected, pre-bf16 means.
        iota = lax.broadcasted_iota(jnp.int32, (tsz, p_tot), 1)
        oh = jnp.logical_or(iota == col_ids_ref[...],
                            iota == row_off_ref[...]).astype(jnp.bfloat16)

        # w0_ref's ones-lane row already carries bias + (global_mean @ w3).
        out = (jnp.dot(vals, w0_ref[...], preferred_element_type=jnp.float32)
               + jnp.dot(oh, mw_ref[...], preferred_element_type=jnp.float32))

        out = jnp.where(out > 0, out, NEG_SLOPE * out)           # leaky_relu

        if with_dropout:
            out = out * mask_ref[...]                  # bf16 {0, 1/(1-p)} mask

        out_ref[...] = out.astype(out_ref.dtype)

    return kernel


# ---------------------------------------------------------------------------
# Wrapper
# ---------------------------------------------------------------------------
def exchangable_forward(indices, values, weight, bias, n_rows, n_cols, *,
                        drop_p=DROP_P, seed=0, tile_nnz=512,
                        out_dtype=jnp.float32):
    """indices: (2, nnz) int32; values: (nnz, in_dim) f32.
    weight: (4*in_dim, out_dim)  (== torch linear.weight.T);  bias: (out_dim,).
    Returns (indices, new_values) -- the output sparse tensor."""
    nnz, in_dim = values.shape
    out_dim = weight.shape[1]
    assert weight.shape[0] == 4 * in_dim

    tile = _round_up(min(tile_nnz, max(nnz, 1)), 128)   # lane-dense id blocks
    n_tiles = max((nnz + tile - 1) // tile, 1)
    splits = 2 if n_tiles >= 2 else 1                   # phase-A core split (v7x)
    n_tiles = _round_up(n_tiles, splits)
    nnz_pad = n_tiles * tile
    tiles_per_core = n_tiles // splits

    d_ext = _round_up(in_dim + 1, 8)       # features + ones/count lane (+ pad)
    out_p = _round_up(out_dim, 128)        # lane-dense output stores
    r_pad = _round_up(n_rows, 8)
    c_pad = _round_up(n_cols, 8)
    p_tot = c_pad + r_pad

    rows = indices[0].astype(jnp.int32)
    cols = indices[1].astype(jnp.int32)

    # ids: col id and (row id + c_pad); padded entries get out-of-range p_tot.
    col_ids = jnp.full((nnz_pad,), p_tot, jnp.int32).at[:nnz].set(cols)
    row_off = jnp.full((nnz_pad,), p_tot, jnp.int32).at[:nnz].set(rows + c_pad)
    col_ids_lane = col_ids.reshape(1, nnz_pad)     # phase A (ids along lanes)
    row_off_lane = row_off.reshape(1, nnz_pad)
    col_ids_sub = col_ids.reshape(nnz_pad, 1)      # phase B (ids along sublanes)
    row_off_sub = row_off.reshape(nnz_pad, 1)

    # values + ones lane, padded and cast to bf16 for the MXU.
    vals_ext = jnp.zeros((nnz_pad, d_ext), jnp.float32)
    vals_ext = vals_ext.at[:nnz, :in_dim].set(values.astype(jnp.float32))
    vals_ext = vals_ext.at[:nnz, in_dim].set(1.0)
    vals_ext = vals_ext.astype(jnp.bfloat16)

    vmem_cap = _vmem_cap_bytes()

    # ---------------- phase A: column/row sums + counts ---------------------
    stats_flops = 2 * nnz_pad * p_tot * d_ext
    stats_bytes = nnz_pad * (d_ext * 2 + 8) + splits * p_tot * d_ext * 4
    vmem_a = int(min(vmem_cap, max(4 * 2**20,
                  2 * tile * d_ext * 2            # vals double-buffer
                  + 2 * 2 * 8 * tile * 4          # two id streams (sublane pad)
                  + 2 * p_tot * d_ext * 4         # resident accumulator bufs
                  + p_tot * tile * 2              # in-register one-hot slab
                  + (2 << 20))))

    sums = pl.pallas_call(
        _stats_kernel,
        grid=(splits, tiles_per_core),
        in_specs=[
            pl.BlockSpec((1, tile), lambda c, t: (0, c * tiles_per_core + t)),
            pl.BlockSpec((1, tile), lambda c, t: (0, c * tiles_per_core + t)),
            pl.BlockSpec((tile, d_ext), lambda c, t: (c * tiles_per_core + t, 0)),
        ],
        out_specs=pl.BlockSpec((1, p_tot, d_ext), lambda c, t: (c, 0, 0)),
        out_shape=jax.ShapeDtypeStruct((splits, p_tot, d_ext), jnp.float32),
        compiler_params=pltpu.CompilerParams(
            dimension_semantics=("parallel", "arbitrary"),
            vmem_limit_bytes=vmem_a),
        cost_estimate=pl.CostEstimate(
            flops=int(stats_flops), transcendentals=0,
            bytes_accessed=int(stats_bytes)),
    )(col_ids_lane, row_off_lane, vals_ext)

    # ---- tiny one-time finalize in XLA: combine cores, normalize, project ---
    sums = jnp.sum(sums, axis=0)                                 # (p_tot, d_ext)
    col_sum, row_sum = sums[:c_pad], sums[c_pad:]
    col_cnt = col_sum[:, in_dim:in_dim + 1]                      # fused counts
    row_cnt = row_sum[:, in_dim:in_dim + 1]
    col_mean = col_sum[:, :in_dim] / (col_cnt + EPS)             # Pool(0) means
    row_mean = row_sum[:, :in_dim] / (row_cnt + EPS)             # Pool(1) means
    gmean = jnp.sum(col_sum[:, :in_dim], axis=0, keepdims=True) / float(nnz)

    w = weight.astype(jnp.float32)
    w0, w1 = w[:in_dim], w[in_dim:2 * in_dim]
    w2, w3 = w[2 * in_dim:3 * in_dim], w[3 * in_dim:]
    both_plus_bias = gmean @ w3 + bias.astype(jnp.float32)[None, :]   # (1, out)

    # w0 extended with the bias + "both" term folded into the ones-lane row.
    w0_ext = jnp.zeros((d_ext, out_p), jnp.float32)
    w0_ext = w0_ext.at[:in_dim, :out_dim].set(w0)
    w0_ext = w0_ext.at[in_dim, :out_dim].set(both_plus_bias[0])
    w0_ext = w0_ext.astype(jnp.bfloat16)

    # Projected means stacked [col_mean @ w1 ; row_mean @ w2], cast once.
    mw = jnp.zeros((p_tot, out_p), jnp.float32)
    mw = mw.at[:c_pad, :out_dim].set(col_mean @ w1)
    mw = mw.at[c_pad:, :out_dim].set(row_mean @ w2)
    mw = mw.astype(jnp.bfloat16)

    # ---------------- phase B: gather + linear + leaky_relu + dropout -------
    with_dropout = float(drop_p) > 0.0
    args = [col_ids_sub, row_off_sub, vals_ext, mw, w0_ext]
    in_specs = [
        pl.BlockSpec((tile, 1), lambda t: (t, 0)),            # col ids
        pl.BlockSpec((tile, 1), lambda t: (t, 0)),            # row ids + c_pad
        pl.BlockSpec((tile, d_ext), lambda t: (t, 0)),        # values + ones
        pl.BlockSpec((p_tot, out_p), lambda t: (0, 0)),       # projected means
        pl.BlockSpec((d_ext, out_p), lambda t: (0, 0)),       # w0 (+bias/both)
    ]
    if with_dropout:
        keep = jax.random.bernoulli(jax.random.PRNGKey(seed),
                                    1.0 - float(drop_p), (nnz_pad, out_p))
        mask = jnp.where(keep, 1.0 / (1.0 - float(drop_p)),
                         0.0).astype(jnp.bfloat16)
        args.append(mask)
        in_specs.append(pl.BlockSpec((tile, out_p), lambda t: (t, 0)))

    out_bytes = jnp.dtype(out_dtype).itemsize
    apply_flops = 2 * nnz_pad * (d_ext + p_tot) * out_p
    apply_bytes = (nnz_pad * (d_ext * 2 + 8 + out_p * out_bytes
                              + (out_p * 2 if with_dropout else 0))
                   + (p_tot + d_ext) * out_p * 2)
    vmem_b = int(min(vmem_cap, max(4 * 2**20,
                  2 * tile * d_ext * 2
                  + 2 * 2 * tile * 128 * 4
                  + 2 * tile * out_p * (out_bytes + (2 if with_dropout else 0))
                  + 2 * (p_tot + d_ext) * out_p * 2
                  + tile * p_tot * 2
                  + (2 << 20))))

    out_padded = pl.pallas_call(
        _make_apply_kernel(with_dropout),
        grid=(n_tiles,),
        in_specs=in_specs,
        out_specs=pl.BlockSpec((tile, out_p), lambda t: (t, 0)),
        out_shape=jax.ShapeDtypeStruct((nnz_pad, out_p), out_dtype),
        compiler_params=pltpu.CompilerParams(
            dimension_semantics=("parallel",),
            vmem_limit_bytes=vmem_b),
        cost_estimate=pl.CostEstimate(
            flops=int(apply_flops), transcendentals=0,
            bytes_accessed=int(apply_bytes)),
    )(*args)

    new_vals = out_padded[:nnz, :out_dim]
    return indices, new_vals


# ---------------------------------------------------------------------------
# Pure-JAX reference of the PyTorch forward (without dropout).
# ---------------------------------------------------------------------------
def _reference(indices, values, weight, bias, n_rows, n_cols):
    rows, cols = indices[0], indices[1]
    d = values.shape[1]
    col_sum = jnp.zeros((n_cols, d)).at[cols].add(values)
    col_cnt = jnp.zeros((n_cols,)).at[cols].add(1.0)
    pool0 = (col_sum / (col_cnt[:, None] + EPS))[cols]
    row_sum = jnp.zeros((n_rows, d)).at[rows].add(values)
    row_cnt = jnp.zeros((n_rows,)).at[rows].add(1.0)
    pool1 = (row_sum / (row_cnt[:, None] + EPS))[rows]
    both = jnp.broadcast_to(values.mean(0, keepdims=True), values.shape)
    x = jnp.concatenate([values, pool0, pool1, both], axis=1)
    y = x @ weight + bias[None, :]
    return jnp.where(y > 0, y, NEG_SLOPE * y)


if __name__ == "__main__":
    key = jax.random.PRNGKey(0)
    k_idx, k_val, k_w, k_b = jax.random.split(key, 4)

    # Small synthetic sparse matrix of shape (R, C) with dense feature dim.
    R, C = 16, 24
    in_dim, out_dim = 16, 32
    nnz = 300

    perm = jax.random.permutation(k_idx, R * C)[:nnz]          # distinct cells
    rows = (perm // C).astype(jnp.int32)
    cols = (perm % C).astype(jnp.int32)
    indices = jnp.stack([rows, cols], axis=0)                   # (2, nnz)
    values = jax.random.normal(k_val, (nnz, in_dim), jnp.float32)

    # Deterministic Linear(4*in_dim, out_dim) init (PyTorch-style uniform).
    fan_in = 4 * in_dim
    bound = 1.0 / (fan_in ** 0.5)
    weight = jax.random.uniform(k_w, (4 * in_dim, out_dim), jnp.float32,
                                -bound, bound)                  # == torch W.T
    bias = jax.random.uniform(k_b, (out_dim,), jnp.float32, -bound, bound)

    # 1) deterministic path (dropout off) vs pure-JAX reference.
    _, out_eval = exchangable_forward(indices, values, weight, bias, R, C,
                                      drop_p=0.0, tile_nnz=512)
    out_eval = jax.block_until_ready(out_eval)
    ref = _reference(indices, values, weight, bias, R, C)
    assert out_eval.shape == (nnz, out_dim)
    assert jnp.allclose(out_eval, ref, atol=5e-2, rtol=5e-2), (
        "mismatch vs JAX reference")

    # 2) training path: streamed-mask dropout (p=0.5). Every entry must be
    #    either exactly dropped (0) or equal to ref/(1-p) within tolerance,
    #    with a keep fraction near 0.5.
    _, out_drop = exchangable_forward(indices, values, weight, bias, R, C,
                                      drop_p=DROP_P, seed=1234, tile_nnz=512)
    out_drop = jax.block_until_ready(out_drop)
    kept = jnp.abs(out_drop) > 1e-6
    scale_ref = ref / (1.0 - DROP_P)
    match = jnp.abs(out_drop - scale_ref) <= (5e-2 + 5e-2 * jnp.abs(scale_ref))
    assert bool(jnp.all(jnp.logical_or(~kept, match))), (
        "dropout-kept entries mismatch")
    keep_frac = float(jnp.mean(kept.astype(jnp.float32)))
    assert 0.3 < keep_frac < 0.7, f"unexpected dropout keep fraction {keep_frac}"

    print("KERNEL_OK")
</pallas_src>

<mosaic_0001>
module attributes {stable_mosaic.version = 11 : i64} {
  func.func @_stats_kernel(%arg0: i32, %arg1: i32, %arg2: memref<1x384xi32, #tpu.memory_space<vmem>>, %arg3: memref<1x384xi32, #tpu.memory_space<vmem>>, %arg4: memref<384x24xbf16, #tpu.memory_space<vmem>>, %arg5: memref<1x40x24xf32, #tpu.memory_space<vmem>>) attributes {dimension_semantics = [#tpu.dimension_semantics<parallel>, #tpu.dimension_semantics<arbitrary>], iteration_bounds = array<i64: 1, 1>, scalar_prefetch = 0 : i64, scratch_operands = 0 : i64, tpu.core_type = #tpu.core_type<tc>, window_params = [{transform_indices = @transform_0, window_bounds = array<i64: 1, 384>}, {transform_indices = @transform_1, window_bounds = array<i64: 1, 384>}, {transform_indices = @transform_2, window_bounds = array<i64: 384, 24>}, {transform_indices = @transform_3, window_bounds = array<i64: 1, 40, 24>}]} {
    %c0_i32 = arith.constant 0 : i32
    %0 = arith.cmpi eq, %arg1, %c0_i32 : i32
    %1 = arith.extui %0 : i1 to i32
    %c0_i32_0 = arith.constant 0 : i32
    %2 = arith.cmpi ne, %1, %c0_i32_0 : i32
    scf.if %2 {
      %cst_12 = arith.constant 0.000000e+00 : f32
      %20 = vector.broadcast %cst_12 : f32 to vector<1x40x24xf32>
      %c0_13 = arith.constant 0 : index
      %c0_14 = arith.constant 0 : index
      %c0_15 = arith.constant 0 : index
      %21 = vector.load %arg5[%c0_13, %c0_14, %c0_15] : memref<1x40x24xf32, #tpu.memory_space<vmem>>, vector<1x40x24xf32>
      tpu.vector_store %arg5[%c0_13, %c0_14, %c0_15], %20 {strides = array<i32>} : memref<1x40x24xf32, #tpu.memory_space<vmem>>, vector<1x40x24xf32>,
    } else {
    }
    %c0 = arith.constant 0 : index
    %c0_1 = arith.constant 0 : index
    %3 = vector.load %arg4[%c0, %c0_1] : memref<384x24xbf16, #tpu.memory_space<vmem>>, vector<384x24xbf16>
    %4 = tpu.iota {dimensions = array<i32: 0>} : vector<40x384xi32>
    %c0_2 = arith.constant 0 : index
    %c0_3 = arith.constant 0 : index
    %5 = vector.load %arg2[%c0_2, %c0_3] : memref<1x384xi32, #tpu.memory_space<vmem>>, vector<1x384xi32>
    %6 = vector.broadcast %5 : vector<1x384xi32> to vector<40x384xi32>
    %7 = arith.cmpi eq, %4, %6 : vector<40x384xi32>
    %c0_4 = arith.constant 0 : index
    %c0_5 = arith.constant 0 : index
    %8 = vector.load %arg3[%c0_4, %c0_5] : memref<1x384xi32, #tpu.memory_space<vmem>>, vector<1x384xi32>
    %9 = vector.broadcast %8 : vector<1x384xi32> to vector<40x384xi32>
    %10 = arith.cmpi eq, %4, %9 : vector<40x384xi32>
    %11 = arith.ori %7, %10 : vector<40x384xi1>
    %12 = arith.extui %11 : vector<40x384xi1> to vector<40x384xi32>
    %13 = arith.sitofp %12 : vector<40x384xi32> to vector<40x384xf32>
    %14 = arith.truncf %13 : vector<40x384xf32> to vector<40x384xbf16>
    %cst = arith.constant dense<0.000000e+00> : vector<40x24xf32>
    %15 = tpu.matmul %14, %3, %cst {dimension_numbers = #tpu.dot_dimension_numbers<[1], [0], [0], [1], [0, 0, 1, 1], [], []>} : vector<40x384xbf16>, vector<384x24xbf16>, vector<40x24xf32> -> vector<40x24xf32>
    %c0_6 = arith.constant 0 : index
    %c0_7 = arith.constant 0 : index
    %c0_8 = arith.constant 0 : index
    %16 = vector.load %arg5[%c0_6, %c0_7, %c0_8] : memref<1x40x24xf32, #tpu.memory_space<vmem>>, vector<1x40x24xf32>
    %17 = vector.shape_cast %15 : vector<40x24xf32> to vector<1x40x24xf32>
    %18 = arith.addf %16, %17 : vector<1x40x24xf32>
    %c0_9 = arith.constant 0 : index
    %c0_10 = arith.constant 0 : index
    %c0_11 = arith.constant 0 : index
    %19 = vector.load %arg5[%c0_9, %c0_10, %c0_11] : memref<1x40x24xf32, #tpu.memory_space<vmem>>, vector<1x40x24xf32>
    tpu.vector_store %arg5[%c0_9, %c0_10, %c0_11], %18 {strides = array<i32>} : memref<1x40x24xf32, #tpu.memory_space<vmem>>, vector<1x40x24xf32>,
    return
  }
  func.func @transform_0(%arg0: i32, %arg1: i32) -> (i32, i32) {
    %c1_i32 = arith.constant 1 : i32
    %0 = arith.muli %arg0, %c1_i32 : i32
    %1 = arith.addi %0, %arg1 : i32
    %c0_i32 = arith.constant 0 : i32
    %c0_i32_0 = arith.constant 0 : i32
    return %c0_i32, %1 : i32, i32
  }
  func.func @transform_1(%arg0: i32, %arg1: i32) -> (i32, i32) {
    %c1_i32 = arith.constant 1 : i32
    %0 = arith.muli %arg0, %c1_i32 : i32
    %1 = arith.addi %0, %arg1 : i32
    %c0_i32 = arith.constant 0 : i32
    %c0_i32_0 = arith.constant 0 : i32
    return %c0_i32, %1 : i32, i32
  }
  func.func @transform_2(%arg0: i32, %arg1: i32) -> (i32, i32) {
    %c1_i32 = arith.constant 1 : i32
    %0 = arith.muli %arg0, %c1_i32 : i32
    %1 = arith.addi %0, %arg1 : i32
    %c0_i32 = arith.constant 0 : i32
    %c0_i32_0 = arith.constant 0 : i32
    return %1, %c0_i32 : i32, i32
  }
  func.func @transform_3(%arg0: i32, %arg1: i32) -> (i32, i32, i32) {
    %c0_i32 = arith.constant 0 : i32
    %c0_i32_0 = arith.constant 0 : i32
    %c0_i32_1 = arith.constant 0 : i32
    return %arg0, %c0_i32, %c0_i32_0 : i32, i32, i32
  }
}

</mosaic_0001>

<bundles_post_ra>
// kernel: tpu_custom_call.1
= control target key start
LH: loop header
LB: loop body
LE: loop exit
PB: predicated region body
PF: predicated region fallthrough
CT: control target
= control target key end

     0   :  { %v694_v1 = vmov 0.0   ;;  %vm930_vm0 = vmmov 0   ;;  %v133_v14 = vlaneseq  ;;  %v696_v40 = vmov 1.0|1.0   ;;  %s926_s2 = inlined_call_operand.vmem [shape: bf16[384,24], index: 2, kind: input, shape index: {}]   ;;  %s927_s0 = inlined_call_operand.vmem [shape: s32[1,384], index: 0, kind: input, shape index: {}]   ;;  %s928_s1 = inlined_call_operand.vmem [shape: s32[1,384], index: 1, kind: input, shape index: {}]   ;;  %s929_s3 = inlined_call_operand.vmem [shape: f32[1,40,24], index: 3, kind: output, shape index: {}]  }
   0x1   :  { %v670_v0 = vld [vmem:[%s926_s2 + $0x40] sm:$0xff]   ;;  %639 = vmatprep.subr.bf16.mxu1 %v694_v1  ;;  %655 = vmatprep.mubr.msk.bf16.mxu1 %vm930_vm0, %v694_v1  ;;  %v673_v4 = vld [vmem:[%s926_s2 + $0x48] sm:$0xff]   ;;  %v676_v7 = vld [vmem:[%s926_s2 + $0x50] sm:$0xff]  }
   0x2   :  { %v671_v2 = vld [vmem:[%s926_s2] sm:$0xff]   ;;  %594 = vmatprep.subr.bf16.mxu0 %v670_v0  ;;  %v674_v5 = vld [vmem:[%s926_s2 + $0x8] sm:$0xff]   ;;  %v677_v8 = vld [vmem:[%s926_s2 + $0x10] sm:$0xff]   ;;  %v772_v18 = vshrl.u32 %v133_v14, 7 }
   0x3   :  { %v672_v3 = vld [vmem:[%s926_s2 + $0x80] sm:$0xff]   ;;  %595 = vmatpush3.bf16.msra.mxu0 %v671_v2  ;;  %v675_v6 = vld [vmem:[%s926_s2 + $0x88] sm:$0xff]   ;;  %v678_v9 = vld [vmem:[%s926_s2 + $0x90] sm:$0xff]  }
   0x4   :  { %640 = vmatpush3.bf16.msra.mxu1 %v672_v3  ;;  %596 = vmatprep.subr.bf16.mxu0 %v673_v4  ;;  %v679_v10 = vld [vmem:[%s926_s2 + $0x58] sm:$0xff]   ;;  %v682_v13 = vld [vmem:[%s926_s2 + $0x60] sm:$0xff]   ;;  %v685_v17 = vld [vmem:[%s926_s2 + $0x68] sm:$0xff]   ;;  %v146_v22 = vsub.s32 1, %v772_v18  ;;  %v142_v23 = vsub.s32 0, %v772_v18  ;;  %v150_v25 = vsub.s32 2, %v772_v18 }
   0x5   :  { %641 = vmatprep.subr.bf16.mxu1 %v694_v1  ;;  %v680_v11 = vld [vmem:[%s926_s2 + $0x18] sm:$0xff]   ;;  %v683_v15 = vld [vmem:[%s926_s2 + $0x20] sm:$0xff]   ;;  %v686_v19 = vld [vmem:[%s926_s2 + $0x28] sm:$0xff]   ;;  %v135_v27 = vadd.s32 8, %v772_v18  ;;  %v136_v39 = vadd.s32 16, %v772_v18  ;;  %v137_v41 = vadd.s32 24, %v772_v18 }
   0x6   :  { %v681_v12 = vld [vmem:[%s926_s2 + $0x98] sm:$0xff]   ;;  %v684_v16 = vld [vmem:[%s926_s2 + $0xa0] sm:$0xff]   ;;  %v687_v20 = vld [vmem:[%s926_s2 + $0xa8] sm:$0xff]   ;;  %v138_v42 = vadd.s32 32, %v772_v18 }
   0x7   :  { %597 = vmatpush3.bf16.msra.mxu0 %v674_v5  ;;  %v688_v21 = vld [vmem:[%s926_s2 + $0x70] sm:$0xff]   ;;  %v691_v28 = vld [vmem:[%s926_s2 + $0x78] sm:$0xff]   ;;  %v139_v29 = vld [vmem:[%s927_s0] sm:$0x7] }
   0x8   :  { %642 = vmatpush3.bf16.msra.mxu1 %v675_v6  ;;  %598 = vmatprep.subr.bf16.mxu0 %v676_v7  ;;  %v689_v24 = vld [vmem:[%s926_s2 + $0x30] sm:$0xff]   ;;  %v167_v30 = vld [vmem:[%s928_s1] sm:$0x7]  ;;  %v804_v31 = vrot.slane %v139_v29, %v146_v22  ;;  %v808_v33 = vrot.slane %v139_v29, %v142_v23  ;;  %v812_v35 = vrot.slane %v139_v29, %v150_v25  ;;  %v692_v37 = vld [vmem:[%s926_s2 + $0x38] sm:$0xff]  }
   0x9   :  { %643 = vmatprep.subr.bf16.mxu1 %v694_v1  ;;  %v690_v26 = vld [vmem:[%s926_s2 + $0xb0] sm:$0xff]   ;;  %v806_v32 = vrot.slane %v167_v30, %v146_v22  ;;  %v810_v34 = vrot.slane %v167_v30, %v142_v23  ;;  %v814_v36 = vrot.slane %v167_v30, %v150_v25  ;;  %v693_v38 = vld [vmem:[%s926_s2 + $0xb8] sm:$0xff]  }
   0xa   :  { %vm153_vm1 = vcmp.eq.s32.totalorder %v772_v18, %v804_v31  ;;  %vm156_vm2 = vcmp.eq.s32.totalorder %v135_v27, %v804_v31  ;;  %vm152_vm6 = vcmp.eq.s32.totalorder %v772_v18, %v808_v33  ;;  %vm155_vm9 = vcmp.eq.s32.totalorder %v135_v27, %v808_v33 }
   0xb   :  { %599 = vmatpush3.bf16.msra.mxu0 %v677_v8  ;;  %vm181_vm3 = vcmp.eq.s32.totalorder %v772_v18, %v806_v32  ;;  %vm184_vm4 = vcmp.eq.s32.totalorder %v135_v27, %v806_v32  ;;  %vm180_vm7 = vcmp.eq.s32.totalorder %v772_v18, %v810_v34  ;;  %vm183_vm10 = vcmp.eq.s32.totalorder %v135_v27, %v810_v34 }
   0xc   :  { %644 = vmatpush3.bf16.msra.mxu1 %v678_v9  ;;  %600 = vmatprep.subr.bf16.mxu0 %v679_v10  ;;  %vm196_vm5 = vmor %vm153_vm1, %vm181_vm3  ;;  %vm154_vm13 = vcmp.eq.s32.totalorder %v772_v18, %v812_v35  ;;  %vm182_vm14 = vcmp.eq.s32.totalorder %v772_v18, %v814_v36  ;;  %vm157_vm1 = vcmp.eq.s32.totalorder %v135_v27, %v812_v35 }
   0xd   :  { %645 = vmatprep.subr.bf16.mxu1 %v694_v1  ;;  %vm199_vm8 = vmor %vm156_vm2, %vm184_vm4  ;;  %vm185_vm2 = vcmp.eq.s32.totalorder %v135_v27, %v814_v36 }
   0xe   :  { %vm576_vm11 = vmpackc.low %vm199_vm8, %vm196_vm5  ;;  %vm159_vm5 = vcmp.eq.s32.totalorder %v136_v39, %v804_v31  ;;  %vm162_vm8 = vcmp.eq.s32.totalorder %v137_v41, %v804_v31 }
   0xf   :  { %601 = vmatpush3.bf16.msra.mxu0 %v680_v11  ;;  %577 = vmatprep.mubr.msk.bf16.mxu0 %vm576_vm11, %v696_v40  ;;  %vm195_vm12 = vmor %vm152_vm6, %vm180_vm7  ;;  %vm187_vm6 = vcmp.eq.s32.totalorder %v136_v39, %v806_v32  ;;  %vm190_vm11 = vcmp.eq.s32.totalorder %v137_v41, %v806_v32 }
  0x10   :  { %646 = vmatpush3.bf16.msra.mxu1 %v681_v12  ;;  %602 = vmatprep.subr.bf16.mxu0 %v682_v13  ;;  %vm198_vm15 = vmor %vm155_vm9, %vm183_vm10  ;;  %vm158_vm10 = vcmp.eq.s32.totalorder %v136_v39, %v808_v33 }
  0x11   :  { %647 = vmatprep.subr.bf16.mxu1 %v694_v1  ;;  %vm578_vm3 = vmpackc.low %vm198_vm15, %vm195_vm12  ;;  %vm186_vm12 = vcmp.eq.s32.totalorder %v136_v39, %v810_v34 }
  0x12   :  { %vm197_vm4 = vmor %vm154_vm13, %vm182_vm14  ;;  %vm161_vm13 = vcmp.eq.s32.totalorder %v137_v41, %v808_v33  ;;  %vm189_vm14 = vcmp.eq.s32.totalorder %v137_v41, %v810_v34 }
  0x13   :  { %603 = vmatpush3.bf16.msra.mxu0 %v683_v15  ;;  %vm200_vm7 = vmor %vm157_vm1, %vm185_vm2 }
  0x14   :  { %648 = vmatpush3.bf16.msra.mxu1 %v684_v16  ;;  %604 = vmatprep.subr.bf16.mxu0 %v685_v17  ;;  %vm588_vm0 = vmpackc.low %vm200_vm7, %vm197_vm4  ;;  %vm188_vm4 = vcmp.eq.s32.totalorder %v136_v39, %v814_v36  ;;  %vm191_vm7 = vcmp.eq.s32.totalorder %v137_v41, %v814_v36 }
  0x15   :  { %649 = vmatprep.subr.bf16.mxu1 %v694_v1  ;;  %vm202_vm9 = vmor %vm159_vm5, %vm187_vm6  ;;  %vm163_vm6 = vcmp.eq.s32.totalorder %v137_v41, %v812_v35 }
  0x16   :  { %vm205_vm15 = vmor %vm162_vm8, %vm190_vm11 }
  0x17   :  { %605 = vmatpush3.bf16.msra.mxu0 %v686_v19  ;;  %vm580_vm1 = vmpackc.low %vm205_vm15, %vm202_vm9  ;;  %vm193_vm9 = vcmp.eq.s32.totalorder %v138_v42, %v806_v32 }
  0x18   :  { %650 = vmatpush3.bf16.msra.mxu1 %v687_v20  ;;  %606 = vmatprep.subr.bf16.mxu0 %v688_v21  ;;  %vm201_vm2 = vmor %vm158_vm10, %vm186_vm12  ;;  %vm164_vm10 = vcmp.eq.s32.totalorder %v138_v42, %v808_v33  ;;  %vm192_vm12 = vcmp.eq.s32.totalorder %v138_v42, %v810_v34 }
  0x19   :  { %651 = vmatprep.subr.bf16.mxu1 %v694_v1  ;;  %vm204_vm5 = vmor %vm161_vm13, %vm189_vm14 }
  0x1a   :  { %vm582_vm8 = vmpackc.low %vm204_vm5, %vm201_vm2  ;;  %vm933_vm2 = vmmov 0   ;;  %vm166_vm5 = vcmp.eq.s32.totalorder %v138_v42, %v812_v35 }
  0x1b   :  { %607 = vmatpush3.bf16.msra.mxu0 %v689_v24  ;;  %vm206_vm15 = vmor %vm163_vm6, %vm191_vm7 }
  0x1c   :  { %652 = vmatpush3.bf16.msra.mxu1 %v690_v26  ;;  %608 = vmatprep.subr.bf16.mxu0 %v691_v28 }
  0x1d   :  { %653 = vmatprep.subr.bf16.mxu1 %v694_v1 }
  0x1f   :  { %609 = vmatpush3.bf16.msra.mxu0 %v692_v37 }
  0x20   :  { %654 = vmatpush3.bf16.msra.mxu1 %v693_v38 }
  0x22   :  { %579 = vmatmul.mubr.msk.bf16.vlgmr.msra.gmra.mrb[0].mxu0 %vm578_vm3, %v696_v40  ;;  %vm932_vm3 = vmmov 0  }
  0x23   :  { %656 = vmatmul.mubr.msk.bf16.vlgmr.msra.gmra.mrb[0].mxu1 %vm588_vm0, %v696_v40  ;;  %581 = vmatprep.mubr.msk.bf16.mxu0 %vm580_vm1, %v696_v40  ;;  %vm160_vm0 = vcmp.eq.s32.totalorder %v136_v39, %v812_v35 }
  0x24   :  { %659 = vmatprep.mubr.msk.bf16.mxu1 %vm932_vm3, %v694_v1  ;;  %vm203_vm11 = vmor %vm160_vm0, %vm188_vm4  ;;  %vm165_vm3 = vcmp.eq.s32.totalorder %v138_v42, %v804_v31  ;;  %vm194_vm0 = vcmp.eq.s32.totalorder %v138_v42, %v814_v36 }
  0x25   :  { %vm590_vm1 = vmpackc.low %vm206_vm15, %vm203_vm11  ;;  %vm79_vm11 = vcmask 195584  }
  0x26   :  { %vm208_vm13 = vmor %vm165_vm3, %vm193_vm9  ;;  %80 = vst.msk [vmem:[%s929_s3] sm:$0xff] %vm79_vm11, %v694_v1 }
  0x27   :  { %vm584_vm14 = vmpackc.low %vm208_vm13, %vm208_vm13  ;;  %81 = vst.msk [vmem:[%s929_s3 + $0x8] sm:$0xff] %vm79_vm11, %v694_v1 }
  0x28   :  { %vm207_vm4 = vmor %vm164_vm10, %vm192_vm12  ;;  %82 = vst.msk [vmem:[%s929_s3 + $0x10] sm:$0xff] %vm79_vm11, %v694_v1 }
  0x29   :  { %vm209_vm6 = vmor %vm166_vm5, %vm194_vm0  ;;  %83 = vst.msk [vmem:[%s929_s3 + $0x18] sm:$0xff] %vm79_vm11, %v694_v1 }
  0x2a   :  { %583 = vmatmul.mubr.msk.bf16.gmra.mrb[4].mxu0 %vm582_vm8, %v696_v40  ;;  %vm586_vm8 = vmpackc.low %vm207_vm4, %vm207_vm4  ;;  %84 = vst.msk [vmem:[%s929_s3 + $0x20] sm:$0xff] %vm79_vm11, %v694_v1 }
  0x2b   :  { %660 = vmatmul.mubr.msk.bf16.gmra.mrb[4].mxu1 %vm590_vm1, %v696_v40  ;;  %585 = vmatprep.mubr.msk.bf16.mxu0 %vm584_vm14, %v696_v40  ;;  %vm592_vm7 = vmpackc.low %vm209_vm6, %vm209_vm6 }
  0x2c   :  { %663 = vmatprep.mubr.msk.bf16.mxu1 %vm933_vm2, %v694_v1 }
  0x2d   :  { %v505_v48 = vld [vmem:[%s929_s3] sm:$0xff] }
  0x2e   :  { %v506_v54 = vld [vmem:[%s929_s3 + $0x8] sm:$0xff] }
  0x2f   :  { %v507_v0 = vld [vmem:[%s929_s3 + $0x10] sm:$0xff] }
  0x30   :  { %v508_v6 = vld [vmem:[%s929_s3 + $0x18] sm:$0xff] }
  0x31   :  { %v509_v16 = vld [vmem:[%s929_s3 + $0x20] sm:$0xff] }
  0x32   :  { %587 = vmatmul.mubr.msk.bf16.gmra.mrb[8].mxu0 %vm586_vm8, %v696_v40 }
  0x33   :  { %664 = vmatmul.mubr.msk.bf16.gmra.mrb[8].mxu1 %vm592_vm7, %v696_v40 }
  0xf5   :  { %v610_v43 = vpop.f32.mrb[0].mxu0 }
  0xf6   :  { %v611_v44 = vpop.f32.mrb[1].mxu0  ;;  %v483_v47 = vpop.f32.mrb[0].mxu1 }
  0xf7   :  { %v612_v45 = vadd.f32 %v611_v44, %v610_v43  ;;  %v613_v46 = vpop.f32.mrb[2].mxu0  ;;  %v657_v51 = vpop.f32.mrb[1].mxu1 }
  0xf8   :  { %v614_v49 = vpop.f32.mrb[3].mxu0  ;;  %v486_v53 = vpop.f32.mrb[2].mxu1 }
  0xf9   :  { %v484_v50 = vadd.f32 %v612_v45, %v483_v47  ;;  %v615_v52 = vadd.f32 %v614_v49, %v613_v46  ;;  %v658_v57 = vpop.f32.mrb[3].mxu1 }
  0xfb   :  { %v510_v55 = vadd.f32 %v505_v48, %v484_v50  ;;  %v487_v56 = vadd.f32 %v615_v52, %v486_v53 }
  0xfd   :  { %516 = vst.msk [vmem:[%s929_s3] sm:$0xff] %vm79_vm11, %v510_v55  ;;  %v511_v58 = vadd.f32 %v506_v54, %v487_v56  ;;  %v616_v59 = vpop.f32.mrb[4].mxu0 }
  0xfe   :  { %v617_v60 = vpop.f32.mrb[5].mxu0  ;;  %v491_v63 = vpop.f32.mrb[4].mxu1 }
  0xff   :  { %517 = vst.msk [vmem:[%s929_s3 + $0x8] sm:$0xff] %vm79_vm11, %v511_v58  ;;  %v618_v61 = vadd.f32 %v617_v60, %v616_v59  ;;  %v619_v62 = vpop.f32.mrb[6].mxu0  ;;  %v661_v3 = vpop.f32.mrb[5].mxu1 }
 0x100   :  { %v620_v1 = vpop.f32.mrb[7].mxu0  ;;  %v494_v5 = vpop.f32.mrb[6].mxu1 }
 0x101   :  { %v492_v2 = vadd.f32 %v618_v61, %v491_v63  ;;  %v621_v4 = vadd.f32 %v620_v1, %v619_v62  ;;  %v662_v9 = vpop.f32.mrb[7].mxu1 }
 0x103   :  { %v512_v7 = vadd.f32 %v507_v0, %v492_v2  ;;  %v495_v8 = vadd.f32 %v621_v4, %v494_v5 }
 0x105   :  { %518 = vst.msk [vmem:[%s929_s3 + $0x10] sm:$0xff] %vm79_vm11, %v512_v7  ;;  %v513_v10 = vadd.f32 %v508_v6, %v495_v8  ;;  %v622_v11 = vpop.f32.mrb[8].mxu0 }
 0x106   :  { %v623_v12 = vpop.f32.mrb[9].mxu0  ;;  %v499_v15 = vpop.f32.mrb[8].mxu1 }
 0x107   :  { %519 = vst.msk [vmem:[%s929_s3 + $0x18] sm:$0xff] %vm79_vm11, %v513_v10  ;;  %v624_v13 = vadd.f32 %v623_v12, %v622_v11  ;;  %v625_v14 = vpop.f32.mrb[10].mxu0  ;;  %v665_v19 = vpop.f32.mrb[9].mxu1 }
 0x108   :  { %v626_v17 = vpop.f32.mrb[11].mxu0  ;;  %v502_v20 = vpop.f32.mrb[10].mxu1 }
 0x109   :  { %v500_v18 = vadd.f32 %v624_v13, %v499_v15  ;;  %v666_v22 = vpop.f32.mrb[11].mxu1 }
 0x10b   :  { %v514_v21 = vadd.f32 %v509_v16, %v500_v18 }
 0x10d   :  { %520 = vst.msk [vmem:[%s929_s3 + $0x20] sm:$0xff] %vm79_vm11, %v514_v21 }

</bundles_post_ra>
